<compile_context>
chip_gen: v7x
topology: tpu7x:2x2x1
jax: 0.10.0
libtpu: 0.0.40
codegen_flags: <defaults>
</compile_context>

<pallas_src>
import functools
import inspect

import jax
import jax.numpy as jnp
from jax.experimental import pallas as pl
from jax.experimental.pallas import tpu as pltpu


def _round_up(x, m):
    return ((x + m - 1) // m) * m


_HAS_PIPELINE_MODE = (
    hasattr(pl, "Buffered")
    and "pipeline_mode" in inspect.signature(pl.BlockSpec).parameters
)


# ---------------------------------------------------------------------------
# Pallas kernel
# ---------------------------------------------------------------------------
def _measurement_kernel(xr_ref, xi_ref, prt_ref, npit_ref, out_ref, acc_ref):
    """One (batch-tile, K-tile) step of out = Xr @ Pr^T + Xi @ (-Pi)^T.

    xr_ref / xi_ref : (TB, TK)     activation tiles (input dtype)
    prt_ref         : (TK, U_pad)  flattened, transposed real projector (f32)
    npit_ref        : (TK, U_pad)  flattened, transposed, NEGATED imag projector (f32)
    out_ref         : (TB, U_pad)  f32 output tile (written on the last K step)
    acc_ref         : (TB, U_pad)  f32 VMEM accumulator (scratch)
    """
    k = pl.program_id(1)

    @pl.when(k == 0)
    def _init():
        acc_ref[...] = jnp.zeros_like(acc_ref)

    xr = xr_ref[...].astype(jnp.float32)
    xi = xi_ref[...].astype(jnp.float32)
    acc = jnp.dot(xr, prt_ref[...], preferred_element_type=jnp.float32)
    acc = acc + jnp.dot(xi, npit_ref[...], preferred_element_type=jnp.float32)
    acc_ref[...] += acc

    @pl.when(k == pl.num_programs(1) - 1)
    def _store():
        out_ref[...] = acc_ref[...].astype(out_ref.dtype)


# ---------------------------------------------------------------------------
# Sizing helpers
# ---------------------------------------------------------------------------
def _device_info():
    """Returns (physical VMEM bytes per TensorCore, TensorCores per chip)."""
    kind = ""
    try:
        kind = jax.devices()[0].device_kind.lower()
    except Exception:
        pass

    phys = None
    try:
        info = pltpu.get_tpu_info()
        cap = getattr(info, "vmem_capacity_bytes", None)
        if cap:
            phys = int(cap)
    except Exception:
        phys = None
    if phys is None:
        # v7x: 64 MiB per TC; v5e/v6e (and older): 128 MiB.
        phys = (64 << 20) if "v7" in kind else (128 << 20)

    # Megacore chips (v4 / v5p / v7x) have 2 TensorCores sharing the grid.
    num_cores = 2 if any(t in kind for t in ("v7", "v5p", "v4")) else 1
    return phys, num_cores


def _choose_tiles(batch, k_pad, u_pad, x_itemsize, budget, row_align, num_cores):
    """Pick (TB, TK): batch tile (rows, multiple of row_align) and K tile (mult of 128)."""
    b_pad = _round_up(max(batch, row_align), row_align)

    # Enough batch tiles for DMA/compute overlap and (on megacore) both TensorCores,
    # but only if the batch is large enough to split.
    desired_steps = max(2, 2 * num_cores)
    tb_cap = _round_up(-(-b_pad // desired_steps), row_align)
    tb_cap = max(row_align, min(4096, tb_cap, b_pad))

    base = (4096, 2048, 1024, 512, 256, 128, 64, 32, 16, 8)
    cands = sorted(
        {min(tb_cap, c) for c in base if min(tb_cap, c) >= row_align} | {tb_cap},
        reverse=True,
    )

    def fits(tb, tk, nk):
        proj_bufs = 1 if nk == 1 else 2           # resident vs pipelined projectors
        x_bytes = 2 * 2 * tb * tk * x_itemsize    # xr, xi: double-buffered
        w_bytes = 2 * proj_bufs * tk * u_pad * 4  # f32 projectors
        o_bytes = 2 * tb * u_pad * 4              # f32 output tile, double-buffered
        a_bytes = tb * u_pad * 4                  # f32 accumulator scratch
        return x_bytes + w_bytes + o_bytes + a_bytes <= budget

    # 1) Whole K resident (single K step) with the largest batch tile that fits.
    #    Don't let TB collapse below 128 just to keep K whole — split K instead.
    tb_floor = min(128, tb_cap)
    for tb in cands:
        if tb >= tb_floor and fits(tb, k_pad, 1):
            return tb, k_pad

    # 2) Split K; prefer a large batch tile, then the largest TK that fits.
    for tb in cands:
        fixed = 3 * tb * u_pad * 4
        per_tk = 4 * tb * x_itemsize + 4 * u_pad * 4
        if budget <= fixed + per_tk * 128:
            continue
        tk = ((budget - fixed) // per_tk) // 128 * 128
        tk = int(min(tk, k_pad))
        if tk >= 128:
            return tb, tk

    # 3) Fallback: minimal tiles.
    return row_align, 128


# ---------------------------------------------------------------------------
# Parameter glue (tiny; precomputed once per layer)
# ---------------------------------------------------------------------------
def _build_projectors(kernel_real, kernel_imag, units, embed_dim):
    """Flattened, transposed, lane-padded projectors in f32. Imag one pre-negated."""
    kr = kernel_real.astype(jnp.float32)                       # (U, D)
    ki = kernel_imag.astype(jnp.float32)                       # (U, D)
    proj_real = kr[:, :, None] * kr[:, None, :] + ki[:, :, None] * ki[:, None, :]
    proj_imag = ki[:, :, None] * kr[:, None, :] - kr[:, :, None] * ki[:, None, :]
    K = embed_dim * embed_dim
    K_pad = _round_up(K, 128)
    U_pad = _round_up(max(units, 1), 128)
    prt = jnp.zeros((K_pad, U_pad), jnp.float32).at[:K, :units].set(
        proj_real.reshape(units, K).T)
    npit = jnp.zeros((K_pad, U_pad), jnp.float32).at[:K, :units].set(
        -proj_imag.reshape(units, K).T)
    return prt, npit


# ---------------------------------------------------------------------------
# Forward
# ---------------------------------------------------------------------------
@functools.partial(jax.jit, static_argnames=("embed_dim", "units"))
def _measure(input_real, input_imag, prt, npit, *, embed_dim, units):
    B = input_real.shape[0]
    D = embed_dim
    U = units
    K = D * D
    K_pad0, U_pad = prt.shape

    # Activations stream in their incoming dtype (bf16 halves HBM traffic).
    x_dtype = input_real.dtype
    if x_dtype not in (jnp.bfloat16, jnp.float32):
        x_dtype = jnp.float32
    x_itemsize = jnp.dtype(x_dtype).itemsize
    row_align = 16 if x_dtype == jnp.bfloat16 else 8

    phys_vmem, num_cores = _device_info()
    vmem_limit = (phys_vmem * 4) // 5                 # ~20% headroom for compiler scratch
    budget = max(vmem_limit - (4 << 20), 8 << 20)     # sizing budget below declared limit

    TB, TK = _choose_tiles(B, K_pad0, U_pad, x_itemsize, budget, row_align, num_cores)

    K_pad = _round_up(K_pad0, TK)
    nk = K_pad // TK
    B_pad = _round_up(max(B, TB), TB)
    nb = B_pad // TB

    if K_pad != K_pad0:
        prt = jnp.pad(prt, ((0, K_pad - K_pad0), (0, 0)))
        npit = jnp.pad(npit, ((0, K_pad - K_pad0), (0, 0)))

    xr = input_real.reshape(B, K).astype(x_dtype)
    xi = input_imag.reshape(B, K).astype(x_dtype)
    if B_pad != B or K_pad != K:
        xr = jnp.pad(xr, ((0, B_pad - B), (0, K_pad - K)))
        xi = jnp.pad(xi, ((0, B_pad - B), (0, K_pad - K)))

    # Resident projectors (constant index_map) need only a single pipeline buffer.
    proj_kwargs = {}
    if nk == 1 and _HAS_PIPELINE_MODE:
        proj_kwargs = {"pipeline_mode": pl.Buffered(1)}

    out_padded = pl.pallas_call(
        _measurement_kernel,
        out_shape=jax.ShapeDtypeStruct((B_pad, U_pad), jnp.float32),
        grid_spec=pltpu.PrefetchScalarGridSpec(
            num_scalar_prefetch=0,
            grid=(nb, nk),
            in_specs=[
                pl.BlockSpec((TB, TK), lambda i, k: (i, k)),              # xr tile
                pl.BlockSpec((TB, TK), lambda i, k: (i, k)),              # xi tile
                pl.BlockSpec((TK, U_pad), lambda i, k: (k, 0), **proj_kwargs),  # Pr^T
                pl.BlockSpec((TK, U_pad), lambda i, k: (k, 0), **proj_kwargs),  # -Pi^T
            ],
            out_specs=pl.BlockSpec((TB, U_pad), lambda i, k: (i, 0)),
            scratch_shapes=[pltpu.VMEM((TB, U_pad), jnp.float32)],
        ),
        compiler_params=pltpu.CompilerParams(
            dimension_semantics=("parallel", "arbitrary"),
            vmem_limit_bytes=int(vmem_limit),
        ),
    )(xr, xi, prt, npit)

    return out_padded[:B, :U]


class ComplexMeasurement:
    def __init__(self, embed_dim, units=5, key=None):
        self.units = units
        self.embed_dim = embed_dim
        if key is None:
            key = jax.random.PRNGKey(42)
        # torch.rand -> uniform [0, 1); F.normalize(p=2, dim=1, eps=1e-10).
        kernel = jax.random.uniform(key, (units, embed_dim, 2), dtype=jnp.float32)
        flat = kernel.reshape(units, -1)
        norm = jnp.maximum(jnp.linalg.norm(flat, axis=1, keepdims=True), 1e-10)
        self.kernel = (flat / norm).reshape(units, embed_dim, 2)
        # Precompute the padded/transposed/pre-negated projector matrices once
        # (avoids rebuilding the O(U*D^2) setup graph on every forward call).
        self._prt, self._npit = _build_projectors(
            self.kernel[:, :, 0], self.kernel[:, :, 1], units, embed_dim)

    def __call__(self, inputs, measure_operator=None):
        if not isinstance(inputs, (list, tuple)):
            raise ValueError("This layer should be called on a list of 2 inputs.")
        if len(inputs) != 2:
            raise ValueError(
                "This layer should be called on a list of 2 inputs. Got "
                + str(len(inputs)) + " inputs."
            )
        input_real, input_imag = inputs

        if measure_operator is None:
            prt, npit = self._prt, self._npit
        else:
            prt, npit = _build_projectors(
                measure_operator[0], measure_operator[1], self.units, self.embed_dim)

        return _measure(input_real, input_imag, prt, npit,
                        embed_dim=self.embed_dim, units=self.units)


def _reference(inputs, kernel, embed_dim, units):
    xr, xi = inputs
    B = xr.shape[0]
    kr = kernel[:, :, 0]
    ki = kernel[:, :, 1]
    pr = kr[:, :, None] * kr[:, None, :] + ki[:, :, None] * ki[:, None, :]
    pi_ = ki[:, :, None] * kr[:, None, :] - kr[:, :, None] * ki[:, None, :]
    return (
        xr.reshape(B, -1).astype(jnp.float32) @ pr.reshape(units, -1).T
        - xi.reshape(B, -1).astype(jnp.float32) @ pi_.reshape(units, -1).T
    )


if __name__ == "__main__":
    B, D, U = 2, 16, 5
    key = jax.random.PRNGKey(0)
    k_real, k_imag, k_param = jax.random.split(key, 3)

    input_real = jax.random.normal(k_real, (B, D, D), dtype=jnp.float32)
    input_imag = jax.random.normal(k_imag, (B, D, D), dtype=jnp.float32)

    layer = ComplexMeasurement(embed_dim=D, units=U, key=k_param)

    out = jax.block_until_ready(layer([input_real, input_imag]))
    ref = _reference([input_real, input_imag], layer.kernel, D, U)
    assert out.shape == (B, U)
    assert jnp.allclose(out, ref, atol=1e-4, rtol=1e-4)

    # Larger, non-tile-aligned batch exercises the multi-step batch grid / padding path.
    B2 = 300
    xr2 = jax.random.normal(jax.random.PRNGKey(1), (B2, D, D), dtype=jnp.float32)
    xi2 = jax.random.normal(jax.random.PRNGKey(2), (B2, D, D), dtype=jnp.float32)
    out2 = jax.block_until_ready(layer([xr2, xi2]))
    ref2 = _reference([xr2, xi2], layer.kernel, D, U)
    assert out2.shape == (B2, U)
    assert jnp.allclose(out2, ref2, atol=1e-3, rtol=1e-3)

    print("KERNEL_OK")
</pallas_src>

<mosaic_0001>
module attributes {stable_mosaic.version = 11 : i64} {
  func.func @_measurement_kernel(%arg0: i32, %arg1: i32, %arg2: memref<8x256xf32, #tpu.memory_space<vmem>>, %arg3: memref<8x256xf32, #tpu.memory_space<vmem>>, %arg4: memref<256x128xf32, #tpu.memory_space<vmem>>, %arg5: memref<256x128xf32, #tpu.memory_space<vmem>>, %arg6: memref<8x128xf32, #tpu.memory_space<vmem>>, %arg7: memref<8x128xf32, #tpu.memory_space<vmem>>) attributes {dimension_semantics = [#tpu.dimension_semantics<parallel>, #tpu.dimension_semantics<arbitrary>], iteration_bounds = array<i64: 1, 1>, scalar_prefetch = 0 : i64, scratch_operands = 1 : i64, tpu.core_type = #tpu.core_type<tc>, window_params = [{transform_indices = @transform_0, window_bounds = array<i64: 8, 256>}, {transform_indices = @transform_1, window_bounds = array<i64: 8, 256>}, {pipeline_mode = #tpu.pipeline_mode<synchronous>, transform_indices = @transform_2, window_bounds = array<i64: 256, 128>}, {pipeline_mode = #tpu.pipeline_mode<synchronous>, transform_indices = @transform_3, window_bounds = array<i64: 256, 128>}, {transform_indices = @transform_4, window_bounds = array<i64: 8, 128>}]} {
    %c0_i32 = arith.constant 0 : i32
    %0 = arith.cmpi eq, %arg1, %c0_i32 : i32
    %1 = arith.extui %0 : i1 to i32
    %c0_i32_0 = arith.constant 0 : i32
    %2 = arith.cmpi ne, %1, %c0_i32_0 : i32
    scf.if %2 {
      %cst_15 = arith.constant 0.000000e+00 : f32
      %16 = vector.broadcast %cst_15 : f32 to vector<8x128xf32>
      %c0_16 = arith.constant 0 : index
      %c0_17 = arith.constant 0 : index
      %17 = vector.load %arg7[%c0_16, %c0_17] : memref<8x128xf32, #tpu.memory_space<vmem>>, vector<8x128xf32>
      tpu.vector_store %arg7[%c0_16, %c0_17], %16 {strides = array<i32>} : memref<8x128xf32, #tpu.memory_space<vmem>>, vector<8x128xf32>,
    } else {
    }
    %c0 = arith.constant 0 : index
    %c0_1 = arith.constant 0 : index
    %3 = vector.load %arg2[%c0, %c0_1] : memref<8x256xf32, #tpu.memory_space<vmem>>, vector<8x256xf32>
    %c0_2 = arith.constant 0 : index
    %c0_3 = arith.constant 0 : index
    %4 = vector.load %arg3[%c0_2, %c0_3] : memref<8x256xf32, #tpu.memory_space<vmem>>, vector<8x256xf32>
    %c0_4 = arith.constant 0 : index
    %c0_5 = arith.constant 0 : index
    %5 = vector.load %arg4[%c0_4, %c0_5] : memref<256x128xf32, #tpu.memory_space<vmem>>, vector<256x128xf32>
    %cst = arith.constant dense<0.000000e+00> : vector<8x128xf32>
    %6 = tpu.matmul %3, %5, %cst {dimension_numbers = #tpu.dot_dimension_numbers<[1], [0], [0], [1], [0, 0, 1, 1], [], []>} : vector<8x256xf32>, vector<256x128xf32>, vector<8x128xf32> -> vector<8x128xf32>
    %c0_6 = arith.constant 0 : index
    %c0_7 = arith.constant 0 : index
    %7 = vector.load %arg5[%c0_6, %c0_7] : memref<256x128xf32, #tpu.memory_space<vmem>>, vector<256x128xf32>
    %cst_8 = arith.constant dense<0.000000e+00> : vector<8x128xf32>
    %8 = tpu.matmul %4, %7, %cst_8 {dimension_numbers = #tpu.dot_dimension_numbers<[1], [0], [0], [1], [0, 0, 1, 1], [], []>} : vector<8x256xf32>, vector<256x128xf32>, vector<8x128xf32> -> vector<8x128xf32>
    %9 = arith.addf %6, %8 : vector<8x128xf32>
    %c0_9 = arith.constant 0 : index
    %c0_10 = arith.constant 0 : index
    %10 = vector.load %arg7[%c0_9, %c0_10] : memref<8x128xf32, #tpu.memory_space<vmem>>, vector<8x128xf32>
    %11 = arith.addf %10, %9 : vector<8x128xf32>
    %c0_11 = arith.constant 0 : index
    %c0_12 = arith.constant 0 : index
    %12 = vector.load %arg7[%c0_11, %c0_12] : memref<8x128xf32, #tpu.memory_space<vmem>>, vector<8x128xf32>
    tpu.vector_store %arg7[%c0_11, %c0_12], %11 {strides = array<i32>} : memref<8x128xf32, #tpu.memory_space<vmem>>, vector<8x128xf32>,
    %c0_i32_13 = arith.constant 0 : i32
    %13 = arith.cmpi eq, %arg1, %c0_i32_13 : i32
    %14 = arith.extui %13 : i1 to i32
    %c0_i32_14 = arith.constant 0 : i32
    %15 = arith.cmpi ne, %14, %c0_i32_14 : i32
    scf.if %15 {
      %c0_15 = arith.constant 0 : index
      %c0_16 = arith.constant 0 : index
      %16 = vector.load %arg7[%c0_15, %c0_16] : memref<8x128xf32, #tpu.memory_space<vmem>>, vector<8x128xf32>
      %c0_17 = arith.constant 0 : index
      %c0_18 = arith.constant 0 : index
      %17 = vector.load %arg6[%c0_17, %c0_18] : memref<8x128xf32, #tpu.memory_space<vmem>>, vector<8x128xf32>
      tpu.vector_store %arg6[%c0_17, %c0_18], %16 {strides = array<i32>} : memref<8x128xf32, #tpu.memory_space<vmem>>, vector<8x128xf32>,
    } else {
    }
    return
  }
  func.func @transform_0(%arg0: i32, %arg1: i32) -> (i32, i32) {
    %c0_i32 = arith.constant 0 : i32
    return %arg0, %arg1 : i32, i32
  }
  func.func @transform_1(%arg0: i32, %arg1: i32) -> (i32, i32) {
    %c0_i32 = arith.constant 0 : i32
    return %arg0, %arg1 : i32, i32
  }
  func.func @transform_2(%arg0: i32, %arg1: i32) -> (i32, i32) {
    %c0_i32 = arith.constant 0 : i32
    %c0_i32_0 = arith.constant 0 : i32
    return %arg1, %c0_i32 : i32, i32
  }
  func.func @transform_3(%arg0: i32, %arg1: i32) -> (i32, i32) {
    %c0_i32 = arith.constant 0 : i32
    %c0_i32_0 = arith.constant 0 : i32
    return %arg1, %c0_i32 : i32, i32
  }
  func.func @transform_4(%arg0: i32, %arg1: i32) -> (i32, i32) {
    %c0_i32 = arith.constant 0 : i32
    %c0_i32_0 = arith.constant 0 : i32
    return %arg0, %c0_i32 : i32, i32
  }
}

</mosaic_0001>

<bundles_post_ra>
// kernel: _measure.1
= control target key start
LH: loop header
LB: loop body
LE: loop exit
PB: predicated region body
PF: predicated region fallthrough
CT: control target
= control target key end

     0   :  { %9 = vsyncpa [#allocation4], 0  ;;  %s658_s0 = inlined_call_operand.hbm [shape: f32[8,256], index: 0, kind: input, shape index: {}]   ;;  %s659_s1 = inlined_call_operand.hbm [shape: f32[8,256], index: 1, kind: input, shape index: {}]   ;;  %s660_s2 = inlined_call_operand.hbm [shape: f32[256,128], index: 2, kind: input, shape index: {}]   ;;  %s661_s3 = inlined_call_operand.hbm [shape: f32[256,128], index: 3, kind: input, shape index: {}]   ;;  %s662_s4 = inlined_call_operand.hbm [shape: f32[8,128], index: 4, kind: output, shape index: {}]  }
   0x1   :  { %10 = vsyncpa [#allocation7], 0 }
   0x2   :  { %11 = vsyncpa [#allocation10], 0 }
   0x3   :  { %12 = vsyncpa [#allocation5], 0  ;;  %s566_s15 = smov [#allocation6]   ;;  %s567_s17 = smov [#allocation3]  }
   0x4   :  { %s29_s16 = sshll.u32 %s566_s15, 4  ;;  %s19_s18 = sshll.u32 %s567_s17, 4  ;;  %s30_s16 = int_to_ptr.vmem [resolvable:$true] %s29_s16  ;;  %s20_s18 = int_to_ptr.vmem [resolvable:$true] %s19_s18 }
   0x5   :  { %s448_s21 = scalar_lea.hbm %s659_s1, 256 }
   0x6   :  { %p449_p0 = scmp.ne.s32.totalorder %s659_s1, %s448_s21  ;;  %p452_p1 = scmp.lt.u32.totalorder %s448_s21, %s659_s1 }
   0x8   :  { %p454_p2 = pnand %p452_p1, %p449_p0 }
   0xa   :  { %457 = shalt.err (!%p454_p2)
}
   0xb   :  { %s458_s26 = scalar_lea.vmem %s30_s16, 256  ;;  %p463_p4 = scmp.lt.s32.totalorder %s30_s16, %s30_s16 }
   0xc   :  { %p459_p3 = scmp.ne.s32.totalorder %s30_s16, %s458_s26  ;;  %p464_p5 = scmp.lt.s32.totalorder %s458_s26, %s458_s26 }
   0xe   :  { %p465_p6 = por %p464_p5, %p463_p4 }
  0x10   :  { %p466_p7 = pnand %p465_p6, %p459_p3 }
  0x12   :  { %469 = shalt.err (!%p466_p7)
}
  0x13   :  { %32 = dma.hbm_to_vmem [thread:$0]  %s659_s1, 256, %s30_s16, [#allocation7]  }
  0x14   :  { %s470_s5 = scalar_lea.hbm %s658_s0, 256 }
  0x15   :  { %p471_p8 = scmp.ne.s32.totalorder %s658_s0, %s470_s5  ;;  %p474_p9 = scmp.lt.u32.totalorder %s470_s5, %s658_s0 }
  0x17   :  { %p476_p10 = pnand %p474_p9, %p471_p8 }
  0x19   :  { %479 = shalt.err (!%p476_p10)
}
  0x1a   :  { %s480_s10 = scalar_lea.vmem %s20_s18, 256  ;;  %p485_p12 = scmp.lt.s32.totalorder %s20_s18, %s20_s18 }
  0x1b   :  { %p481_p11 = scmp.ne.s32.totalorder %s20_s18, %s480_s10  ;;  %p486_p13 = scmp.lt.s32.totalorder %s480_s10, %s480_s10 }
  0x1d   :  { %p487_p0 = por %p486_p13, %p485_p12 }
  0x1f   :  { %p488_p1 = pnand %p487_p0, %p481_p11 }
  0x21   :  { %491 = shalt.err (!%p488_p1)
}
  0x22   :  { %22 = dma.hbm_to_vmem [thread:$0]  %s658_s0, 256, %s20_s18, [#allocation4]  }
  0x23   :  { %s568_s12 = smov [#allocation8]   ;;  %s492_s16 = scalar_lea.hbm %s660_s2, 4096 }
  0x24   :  { %s38_s13 = sshll.u32 %s568_s12, 4  ;;  %p493_p2 = scmp.ne.s32.totalorder %s660_s2, %s492_s16  ;;  %s39_s13 = int_to_ptr.vmem [resolvable:$true] %s38_s13 }
  0x25   :  { %p496_p3 = scmp.lt.u32.totalorder %s492_s16, %s660_s2 }
  0x27   :  { %p498_p4 = pnand %p496_p3, %p493_p2 }
  0x29   :  { %501 = shalt.err (!%p498_p4)
}
  0x2a   :  { %s502_s22 = scalar_lea.vmem %s39_s13, 4096  ;;  %p507_p6 = scmp.lt.s32.totalorder %s39_s13, %s39_s13 }
  0x2b   :  { %p503_p5 = scmp.ne.s32.totalorder %s39_s13, %s502_s22  ;;  %p508_p7 = scmp.lt.s32.totalorder %s502_s22, %s502_s22 }
  0x2d   :  { %p509_p8 = por %p508_p7, %p507_p6 }
  0x2f   :  { %p510_p9 = pnand %p509_p8, %p503_p5 }
  0x31   :  { %513 = shalt.err (!%p510_p9)
}
  0x32   :  { %s569_s0 = smov 128   ;;  %s570_s18 = smov 8  }
  0x33   :  { %44 = dma.hbm_to_vmem [thread:$0]  %s660_s2, 4096, %s39_s13, [#allocation7], %s569_s0, %s569_s0, %s570_s18  }
  0x34   :  { %s571_s25 = smov [#allocation9]   ;;  %s514_s29 = scalar_lea.hbm %s661_s3, 4096 }
  0x35   :  { %s50_s26 = sshll.u32 %s571_s25, 4  ;;  %p515_p10 = scmp.ne.s32.totalorder %s661_s3, %s514_s29  ;;  %s51_s26 = int_to_ptr.vmem [resolvable:$true] %s50_s26 }
  0x36   :  { %p518_p11 = scmp.lt.u32.totalorder %s514_s29, %s661_s3 }
  0x38   :  { %p520_p12 = pnand %p518_p11, %p515_p10 }
  0x3a   :  { %523 = shalt.err (!%p520_p12)
}
  0x3b   :  { %s524_s8 = scalar_lea.vmem %s51_s26, 4096  ;;  %p529_p0 = scmp.lt.s32.totalorder %s51_s26, %s51_s26 }
  0x3c   :  { %p525_p13 = scmp.ne.s32.totalorder %s51_s26, %s524_s8  ;;  %p530_p1 = scmp.lt.s32.totalorder %s524_s8, %s524_s8 }
  0x3e   :  { %p531_p2 = por %p530_p1, %p529_p0 }
  0x40   :  { %p532_p3 = pnand %p531_p2, %p525_p13 }
  0x42   :  { %535 = shalt.err (!%p532_p3)
}
  0x43   :  { %56 = dma.hbm_to_vmem [thread:$0]  %s661_s3, 4096, %s51_s26, [#allocation10], %s569_s0, %s569_s0, %s570_s18  }
  0x44   :  { %558 = dma.done.wait [#allocation4], 256  }
  0x45   :  { %559 = vsyncadd [#allocation4], 4294967040 }
  0x46   :  { %560 = dma.done.wait [#allocation7], 4352  }
  0x47   :  { %561 = vsyncadd [#allocation7], 4294962944 }
  0x48   :  { %562 = dma.done.wait [#allocation10], 4096  }
  0x49   :  { %563 = vsyncadd [#allocation10], 4294963200  ;;  %v126_v0 = vld [vmem:[#allocation9 + $0x80] sm:$0xff]  ;;  %v127_v1 = vld [vmem:[#allocation9 + $0x88] sm:$0xff]  ;;  %s572_s3 = smov [#allocation11]  }
  0x4a   :  { %v94_v2 = vld [vmem:[#allocation8 + $0x80] sm:$0xff]  ;;  %v377_v3 = vpack.c.bf16 %v127_v1, %v126_v0  ;;  %v95_v4 = vld [vmem:[#allocation8 + $0x88] sm:$0xff]  ;;  %v128_v11 = vld [vmem:[#allocation9 + $0x90] sm:$0xff]  ;;  %s296_s10 = sshll.u32 %s572_s3, 4  ;;  %s297_s10 = int_to_ptr.vmem [resolvable:$true] %s296_s10 }
  0x4b   :  { %v110_v5 = vld [vmem:[#allocation9] sm:$0xff]  ;;  %v111_v6 = vld [vmem:[#allocation9 + $0x8] sm:$0xff]  ;;  %v409_v7 = vpack.c.bf16 %v95_v4, %v94_v2  ;;  %v129_v13 = vld [vmem:[#allocation9 + $0x98] sm:$0xff]  ;;  %s536_s1 = scalar_lea.vmem %s297_s10, 128  ;;  %p541_p5 = scmp.lt.s32.totalorder %s297_s10, %s297_s10 }
  0x4c   :  { %v379_v8 = vpack.c.bf16 %v111_v6, %v110_v5  ;;  %v78_v9 = vld [vmem:[#allocation8] sm:$0xff]  ;;  %v79_v10 = vld [vmem:[#allocation8 + $0x8] sm:$0xff]  ;;  %378 = vmatprep.subr.bf16.mxu0 %v377_v3  ;;  %v96_v14 = vld [vmem:[#allocation8 + $0x90] sm:$0xff]  ;;  %v381_v16 = vpack.c.bf16 %v129_v13, %v128_v11  ;;  %p537_p4 = scmp.ne.s32.totalorder %s297_s10, %s536_s1  ;;  %p542_p6 = scmp.lt.s32.totalorder %s536_s1, %s536_s1 }
  0x4d   :  { %v411_v12 = vpack.c.bf16 %v79_v10, %v78_v9  ;;  %v97_v15 = vld [vmem:[#allocation8 + $0x98] sm:$0xff]  ;;  %410 = vmatprep.subr.bf16.mxu1 %v409_v7  ;;  %v112_v18 = vld [vmem:[#allocation9 + $0x10] sm:$0xff]  ;;  %v130_v23 = vld [vmem:[#allocation9 + $0xa0] sm:$0xff] }
  0x4e   :  { %380 = vmatpush3.bf16.msra.mxu0 %v379_v8  ;;  %v413_v17 = vpack.c.bf16 %v97_v15, %v96_v14  ;;  %v113_v19 = vld [vmem:[#allocation9 + $0x18] sm:$0xff]  ;;  %v80_v20 = vld [vmem:[#allocation8 + $0x10] sm:$0xff]  ;;  %v131_v24 = vld [vmem:[#allocation9 + $0xa8] sm:$0xff]  ;;  %p543_p7 = por %p542_p6, %p541_p5 }
  0x4f   :  { %412 = vmatpush3.bf16.msra.mxu1 %v411_v12  ;;  %v383_v21 = vpack.c.bf16 %v113_v19, %v112_v18  ;;  %v81_v22 = vld [vmem:[#allocation8 + $0x18] sm:$0xff]  ;;  %382 = vmatprep.subr.bf16.mxu0 %v381_v16  ;;  %v385_v26 = vpack.c.bf16 %v131_v24, %v130_v23  ;;  %v98_v27 = vld [vmem:[#allocation8 + $0xa0] sm:$0xff]  ;;  %v99_v28 = vld [vmem:[#allocation8 + $0xa8] sm:$0xff] }
  0x50   :  { %414 = vmatprep.subr.bf16.mxu1 %v413_v17  ;;  %v415_v25 = vpack.c.bf16 %v81_v22, %v80_v20  ;;  %v114_v29 = vld [vmem:[#allocation9 + $0x20] sm:$0xff]  ;;  %v417_v30 = vpack.c.bf16 %v99_v28, %v98_v27  ;;  %v115_v31 = vld [vmem:[#allocation9 + $0x28] sm:$0xff]  ;;  %v132_v35 = vld [vmem:[#allocation9 + $0xb0] sm:$0xff]  ;;  %p544_p8 = pnand %p543_p7, %p537_p4 }
  0x51   :  { %v82_v32 = vld [vmem:[#allocation8 + $0x20] sm:$0xff]  ;;  %v83_v33 = vld [vmem:[#allocation8 + $0x28] sm:$0xff]  ;;  %v387_v34 = vpack.c.bf16 %v115_v31, %v114_v29  ;;  %v133_v36 = vld [vmem:[#allocation9 + $0xb8] sm:$0xff] }
  0x52   :  { %384 = vmatpush3.bf16.msra.mxu0 %v383_v21  ;;  %v100_v37 = vld [vmem:[#allocation8 + $0xb0] sm:$0xff]  ;;  %v419_v38 = vpack.c.bf16 %v83_v33, %v82_v32  ;;  %v389_v39 = vpack.c.bf16 %v133_v36, %v132_v35  ;;  %v101_v40 = vld [vmem:[#allocation8 + $0xb8] sm:$0xff]  ;;  %v134_v46 = vld [vmem:[#allocation9 + $0xc0] sm:$0xff] }
  0x53   :  { %416 = vmatpush3.bf16.msra.mxu1 %v415_v25  ;;  %386 = vmatprep.subr.bf16.mxu0 %v385_v26  ;;  %v116_v41 = vld [vmem:[#allocation9 + $0x30] sm:$0xff]  ;;  %v117_v42 = vld [vmem:[#allocation9 + $0x38] sm:$0xff]  ;;  %v421_v43 = vpack.c.bf16 %v101_v40, %v100_v37  ;;  %v135_v47 = vld [vmem:[#allocation9 + $0xc8] sm:$0xff] }
  0x54   :  { %418 = vmatprep.subr.bf16.mxu1 %v417_v30  ;;  %v84_v44 = vld [vmem:[#allocation8 + $0x30] sm:$0xff]  ;;  %v85_v45 = vld [vmem:[#allocation8 + $0x38] sm:$0xff]  ;;  %v102_v48 = vld [vmem:[#allocation8 + $0xc0] sm:$0xff]  ;;  %v391_v50 = vpack.c.bf16 %v117_v42, %v116_v41  ;;  %v393_v52 = vpack.c.bf16 %v135_v47, %v134_v46 }
  0x55   :  { %v103_v49 = vld [vmem:[#allocation8 + $0xc8] sm:$0xff]  ;;  %v423_v51 = vpack.c.bf16 %v85_v45, %v84_v44  ;;  %v118_v53 = vld [vmem:[#allocation9 + $0x40] sm:$0xff]  ;;  %v136_v58 = vld [vmem:[#allocation9 + $0xd0] sm:$0xff] }
  0x56   :  { %388 = vmatpush3.bf16.msra.mxu0 %v387_v34  ;;  %v119_v54 = vld [vmem:[#allocation9 + $0x48] sm:$0xff]  ;;  %v86_v55 = vld [vmem:[#allocation8 + $0x40] sm:$0xff]  ;;  %v425_v56 = vpack.c.bf16 %v103_v49, %v102_v48  ;;  %v137_v59 = vld [vmem:[#allocation9 + $0xd8] sm:$0xff] }
  0x57   :  { %420 = vmatpush3.bf16.msra.mxu1 %v419_v38  ;;  %390 = vmatprep.subr.bf16.mxu0 %v389_v39  ;;  %v87_v57 = vld [vmem:[#allocation8 + $0x48] sm:$0xff]  ;;  %v104_v60 = vld [vmem:[#allocation8 + $0xd0] sm:$0xff]  ;;  %v105_v61 = vld [vmem:[#allocation8 + $0xd8] sm:$0xff]  ;;  %v395_v62 = vpack.c.bf16 %v119_v54, %v118_v53  ;;  %v397_v0 = vpack.c.bf16 %v137_v59, %v136_v58 }
  0x58   :  { %422 = vmatprep.subr.bf16.mxu1 %v421_v43  ;;  %v427_v63 = vpack.c.bf16 %v87_v57, %v86_v55  ;;  %v120_v1 = vld [vmem:[#allocation9 + $0x50] sm:$0xff]  ;;  %v121_v2 = vld [vmem:[#allocation9 + $0x58] sm:$0xff]  ;;  %v429_v4 = vpack.c.bf16 %v105_v61, %v104_v60  ;;  %v138_v6 = vld [vmem:[#allocation9 + $0xe0] sm:$0xff] }
  0x59   :  { %v88_v3 = vld [vmem:[#allocation8 + $0x50] sm:$0xff]  ;;  %v89_v5 = vld [vmem:[#allocation8 + $0x58] sm:$0xff]  ;;  %v139_v7 = vld [vmem:[#allocation9 + $0xe8] sm:$0xff]  ;;  %v399_v10 = vpack.c.bf16 %v121_v2, %v120_v1 }
  0x5a   :  { %392 = vmatpush3.bf16.msra.mxu0 %v391_v50  ;;  %v106_v8 = vld [vmem:[#allocation8 + $0xe0] sm:$0xff]  ;;  %v107_v9 = vld [vmem:[#allocation8 + $0xe8] sm:$0xff]  ;;  %v431_v13 = vpack.c.bf16 %v89_v5, %v88_v3  ;;  %v401_v14 = vpack.c.bf16 %v139_v7, %v138_v6  ;;  %v77_v16 = vld [vmem:[#allocation6 + $0x8] sm:$0xff] }
  0x5b   :  { %424 = vmatpush3.bf16.msra.mxu1 %v423_v51  ;;  %394 = vmatprep.subr.bf16.mxu0 %v393_v52  ;;  %v122_v11 = vld [vmem:[#allocation9 + $0x60] sm:$0xff]  ;;  %v123_v12 = vld [vmem:[#allocation9 + $0x68] sm:$0xff]  ;;  %v433_v18 = vpack.c.bf16 %v107_v9, %v106_v8  ;;  %v140_v20 = vld [vmem:[#allocation9 + $0xf0] sm:$0xff] }
  0x5c   :  { %426 = vmatprep.subr.bf16.mxu1 %v425_v56  ;;  %v90_v15 = vld [vmem:[#allocation8 + $0x60] sm:$0xff]  ;;  %v75_v17 = vld [vmem:[#allocation3 + $0x8] sm:$0xff]  ;;  %v141_v21 = vld [vmem:[#allocation9 + $0xf8] sm:$0xff]  ;;  %206 = vmatprep.mubr.f32.mxu0 %v77_v16  ;;  %v403_v24 = vpack.c.bf16 %v123_v12, %v122_v11 }
  0x5d   :  { %v91_v19 = vld [vmem:[#allocation8 + $0x68] sm:$0xff]  ;;  %v108_v22 = vld [vmem:[#allocation8 + $0xf0] sm:$0xff]  ;;  %v109_v23 = vld [vmem:[#allocation8 + $0xf8] sm:$0xff]  ;;  %276 = vmatprep.mubr.f32.mxu1 %v75_v17  ;;  %v405_v26 = vpack.c.bf16 %v141_v21, %v140_v20 }
  0x5e   :  { %396 = vmatpush3.bf16.msra.mxu0 %v395_v62  ;;  %v435_v25 = vpack.c.bf16 %v91_v19, %v90_v15  ;;  %v124_v27 = vld [vmem:[#allocation9 + $0x70] sm:$0xff]  ;;  %v125_v28 = vld [vmem:[#allocation9 + $0x78] sm:$0xff]  ;;  %v437_v29 = vpack.c.bf16 %v109_v23, %v108_v22  ;;  %v74_v35 = vld [vmem:[#allocation3] sm:$0xff] }
  0x5f   :  { %428 = vmatpush3.bf16.msra.mxu1 %v427_v63  ;;  %398 = vmatprep.subr.bf16.mxu0 %v397_v0  ;;  %v92_v30 = vld [vmem:[#allocation8 + $0x70] sm:$0xff]  ;;  %v93_v31 = vld [vmem:[#allocation8 + $0x78] sm:$0xff]  ;;  %v407_v32 = vpack.c.bf16 %v125_v28, %v124_v27 }
  0x60   :  { %430 = vmatprep.subr.bf16.mxu1 %v429_v4  ;;  %v439_v33 = vpack.c.bf16 %v93_v31, %v92_v30  ;;  %v76_v34 = vld [vmem:[#allocation6] sm:$0xff] }
  0x62   :  { %400 = vmatpush3.bf16.msra.mxu0 %v399_v10 }
  0x63   :  { %432 = vmatpush3.bf16.msra.mxu1 %v431_v13  ;;  %402 = vmatprep.subr.bf16.mxu0 %v401_v14 }
  0x64   :  { %434 = vmatprep.subr.bf16.mxu1 %v433_v18 }
  0x66   :  { %404 = vmatpush3.bf16.msra.mxu0 %v403_v24 }
  0x67   :  { %436 = vmatpush3.bf16.msra.mxu1 %v435_v25  ;;  %406 = vmatprep.subr.bf16.mxu0 %v405_v26 }
  0x68   :  { %438 = vmatprep.subr.bf16.mxu1 %v437_v29 }
  0x6a   :  { %408 = vmatpush3.bf16.msra.mxu0 %v407_v32 }
  0x6b   :  { %440 = vmatpush3.bf16.msra.mxu1 %v439_v33 }
  0x6d   :  { %207 = vmatmul.mubr.f32.vlgmr.msra.gmra.mrb[0].mxu0 %v76_v34 }
  0x6e   :  { %277 = vmatmul.mubr.f32.vlgmr.msra.gmra.mrb[0].mxu1 %v74_v35 }
 0x140   :  { %v339_v36 = vpop.f32.mrb[0].mxu0 }
 0x141   :  { %v374_v37 = vpop.f32.mrb[0].mxu1  ;;  %v340_v38 = vpop.f32.mrb[1].mxu0 }
 0x142   :  { %v341_v39 = vadd.f32 %v340_v38, %v339_v36  ;;  %v375_v40 = vpop.f32.mrb[1].mxu1 }
 0x143   :  { %v376_v41 = vadd.f32 %v375_v40, %v374_v37 }
 0x145   :  { %v279_v42 = vadd.f32 %v376_v41, %v341_v39 }
 0x147   :  { %289 = vst [vmem:[#allocation11] sm:$0xff] %v279_v42 }
 0x148   :  { %547 = shalt.err (!%p544_p8)
}
 0x149   :  { %s548_s13 = scalar_lea.hbm %s662_s4, 128 }
 0x14a   :  { %p549_p9 = scmp.ne.s32.totalorder %s662_s4, %s548_s13  ;;  %p552_p10 = scmp.lt.u32.totalorder %s548_s13, %s662_s4 }
 0x14c   :  { %p554_p11 = pnand %p552_p10, %p549_p9 }
 0x14e   :  { %557 = shalt.err (!%p554_p11)
}
 0x14f   :  { %299 = dma.vmem_to_hbm [thread:$0]  %s297_s10, 128, %s662_s4, [#allocation5]  }
 0x150   :  { %564 = dma.done.wait [#allocation5], 128  }
 0x151   :  { %565 = vsyncadd [#allocation5], 4294967168 }
 0x152   :  { %303 = vsyncpa [#allocation4], 1 }
 0x153   :  { %304 = vsyncpa [#allocation7], 1 }
 0x154   :  { %305 = vsyncpa [#allocation10], 1 }
 0x155   :  { %306 = vsyncpa [#allocation5], 1 }

</bundles_post_ra>
